<compile_context>
chip_gen: v7x
topology: tpu7x:2x2x1
jax: 0.10.0
libtpu: 0.0.40
codegen_flags: <defaults>
</compile_context>

<pallas_src>
from functools import partial

import jax
import jax.numpy as jnp
import numpy as np
from jax.experimental import pallas as pl
from jax.experimental.pallas import tpu as pltpu


def _round_up(x: int, m: int) -> int:
    return ((x + m - 1) // m) * m


def _pick_batch_tile(batch: int) -> tuple[int, int]:
    """Choose (batch_tile, padded_batch). Tile is a multiple of 8 (sublane
    alignment), capped at 256 MXU rows, and once the batch is big enough we
    aim for >=2 grid steps so a megacore chip (v7x) can shard across cores."""
    b8 = _round_up(batch, 8)
    if b8 <= 16:
        tile = b8
    elif b8 <= 512:
        tile = _round_up((b8 + 1) // 2, 8)
    else:
        tile = 256
    return tile, _round_up(batch, tile)


def _decoder_kernel(xh_ref, q_ref, c_ref,
                    wg1_ref, w23_ref, bg2_ref, wg4_ref,
                    wxh_ref, wattn_ref, blstm_ref,
                    out_ref, mem_ref, *, d_valid: int):
    """One grid step == one tile of TB batch rows (batch on the MXU row axis)."""
    f32 = jnp.float32
    tb, dp, hid = q_ref.shape
    cdt = wg1_ref.dtype                        # MXU operand dtype (bf16 by default)

    xh = xh_ref[...]                           # (TB, 2H) = [context, hidden]
    q = q_ref[...]                             # (TB, dp, H), dp = padded seq length

    # ---- additive attention scores (attention_1.score) ----
    # g2(context) + g3(hidden) fused into a single matmul against [wg2^T ; wg3^T].
    g23 = jnp.dot(xh, w23_ref[...], preferred_element_type=f32) + bg2_ref[...]      # (TB, H)
    # g1(question): all batch*seq rows feed the MXU together.
    g1 = jnp.dot(q.reshape(tb * dp, hid), wg1_ref[...],
                 preferred_element_type=f32).reshape(tb, dp, hid)                    # (TB, dp, H)
    t = jnp.tanh(g1 + g23[:, None, :])                                               # (TB, dp, H)

    # linear_g4 as a lane reduction against the (1, H) weight row.
    # (bg4 is dropped: it is constant along the softmax axis and cancels exactly.)
    e = jnp.sum(t * wg4_ref[...], axis=-1)                                            # (TB, dp)
    if d_valid < dp:                                                                  # mask padded keys
        key_ids = jax.lax.broadcasted_iota(jnp.int32, (tb, dp), 1)
        e = jnp.where(key_ids < d_valid, e, -1e30)

    # softmax over the question axis (dense lane reductions, EUP exp).
    e = e - jnp.max(e, axis=-1, keepdims=True)
    p = jnp.exp(e)
    a = p * pl.reciprocal(jnp.sum(p, axis=-1, keepdims=True), approx=True)            # (TB, dp)

    # attention combination: attn[b] = sum_k a[b, k] * question[b, k, :]
    attn = jnp.sum(a[:, :, None] * q.astype(f32), axis=1)                             # (TB, H)

    # ---- one LSTM step on concat([context, attn]) ----
    # concat folded into fused weights: [ctx, h] @ [Wih_ctx^T ; Whh^T] + attn @ Wih_attn^T
    gates = (jnp.dot(xh, wxh_ref[...], preferred_element_type=f32)
             + jnp.dot(attn.astype(cdt), wattn_ref[...], preferred_element_type=f32)
             + blstm_ref[...])                                                        # (TB, 4H)

    i_g = jax.nn.sigmoid(gates[:, 0 * hid:1 * hid])
    f_g = jax.nn.sigmoid(gates[:, 1 * hid:2 * hid])
    g_g = jnp.tanh(gates[:, 2 * hid:3 * hid])
    o_g = jax.nn.sigmoid(gates[:, 3 * hid:4 * hid])

    c_new = f_g * c_ref[...].astype(f32) + i_g * g_g
    h_new = o_g * jnp.tanh(c_new)

    out_ref[...] = h_new.astype(out_ref.dtype)
    mem_ref[...] = c_new.astype(mem_ref.dtype)


def decoder_forward(context, question, hidden, mem, params, *,
                    compute_dtype=jnp.bfloat16):
    """context (B,H), question (B,d,H), hidden (1,B,H), mem (1,B,H)
       -> (output (B,1,H), mem (1,B,H)), matching the PyTorch module."""
    B, H = context.shape
    d = question.shape[1]
    out_dtype = context.dtype
    cdt = jnp.dtype(compute_dtype)
    f32 = jnp.float32

    TB, Bp = _pick_batch_tile(B)
    # Pad the question length to a full native sublane tile of the compute dtype
    # so the (TB, dp, H) -> (TB*dp, H) reshape in the kernel is layout-free.
    sublane = 8 * (4 // cdt.itemsize)
    dp = _round_up(d, sublane)

    # Batch-major activations. [context, hidden] is concatenated once here so the
    # kernel never concatenates along lanes; activations feeding the MXU are bf16.
    xh = jnp.concatenate([context, hidden[0]], axis=-1).astype(cdt)     # (B, 2H)
    qc = question.astype(cdt)                                           # (B, d, H)
    c0 = mem[0]                                                         # (B, H), stays f32

    xh = jnp.pad(xh, ((0, Bp - B), (0, 0)))
    qc = jnp.pad(qc, ((0, Bp - B), (0, dp - d), (0, 0)))
    c0 = jnp.pad(c0, ((0, Bp - B), (0, 0)))

    # Weights, pre-transposed (PyTorch Linear computes x @ W^T) and fused.
    wg1_t = params["wg1"].T.astype(cdt)                                              # (H, H)
    w23 = jnp.concatenate([params["wg2"].T, params["wg3"].T], axis=0).astype(cdt)    # (2H, H)
    bg2 = params["bg2"].reshape(1, H).astype(f32)
    wg4 = params["wg4"].reshape(1, H).astype(f32)
    wih_t = params["w_ih"].T                                                         # (2H, 4H): rows [ctx | attn]
    w_xh = jnp.concatenate([wih_t[:H], params["w_hh"].T], axis=0).astype(cdt)        # (2H, 4H) for [ctx, hidden]
    w_attn = wih_t[H:].astype(cdt)                                                   # (H, 4H)
    blstm = (params["b_ih"] + params["b_hh"]).reshape(1, 4 * H).astype(f32)

    grid = (Bp // TB,)

    def batched(shape):
        n = len(shape)
        return pl.BlockSpec(shape, lambda i, n=n: (i,) + (0,) * (n - 1))

    def const(shape):
        n = len(shape)
        return pl.BlockSpec(shape, lambda i, n=n: (0,) * n)

    in_specs = [
        batched((TB, 2 * H)),        # [context, hidden]
        batched((TB, dp, H)),        # question
        batched((TB, H)),            # cell state
        const((H, H)),               # wg1^T
        const((2 * H, H)),           # [wg2^T ; wg3^T]
        const((1, H)),               # bg2
        const((1, H)),               # wg4 row
        const((2 * H, 4 * H)),       # [W_ih(ctx)^T ; W_hh^T]
        const((H, 4 * H)),           # W_ih(attn)^T
        const((1, 4 * H)),           # b_ih + b_hh
    ]
    out_specs = [batched((TB, H)), batched((TB, H))]
    out_shape = [jax.ShapeDtypeStruct((Bp, H), out_dtype),
                 jax.ShapeDtypeStruct((Bp, H), out_dtype)]

    # Scoped-VMEM budget: (double-buffered) weights + per-step blocks, capped at
    # the smallest per-TensorCore VMEM across v5e/v6e/v7x (64 MiB on v7x).
    weight_bytes = sum(int(w.size) * w.dtype.itemsize
                       for w in (wg1_t, w23, bg2, wg4, w_xh, w_attn, blstm))
    block_bytes = ((TB * 2 * H + TB * dp * H) * cdt.itemsize
                   + 3 * TB * H * jnp.dtype(out_dtype).itemsize)
    vmem_limit = int(min(max(2 * (weight_bytes + block_bytes) + (8 << 20), 32 << 20),
                         64 << 20))

    out_p, mem_p = pl.pallas_call(
        partial(_decoder_kernel, d_valid=d),
        grid=grid,
        in_specs=in_specs,
        out_specs=out_specs,
        out_shape=out_shape,
        compiler_params=pltpu.CompilerParams(
            dimension_semantics=("parallel",),
            vmem_limit_bytes=vmem_limit),
    )(xh, qc, c0, wg1_t, w23, bg2, wg4, w_xh, w_attn, blstm)

    output = out_p[:B][:, None, :]        # (B, 1, H): batch_first LSTM output
    mem_new = mem_p[:B][None, :, :]       # (1, B, H): new cell state
    return output, mem_new


def _reference(context, question, hidden, mem, p):
    """Plain-JAX f32 replica of the PyTorch forward (sanity check)."""
    B, H = context.shape
    g3 = jnp.transpose(hidden, (1, 0, 2)) @ p["wg3"].T                     # (B,1,H)
    g2 = (context @ p["wg2"].T + p["bg2"])[:, None, :]                     # (B,1,H)
    g1 = question @ p["wg1"].T                                             # (B,d,H)
    t = jnp.tanh(g1 + g2 + g3)
    e = t @ p["wg4"].T + p["bg4"]                                          # (B,d,1)
    a = jax.nn.softmax(e, axis=1)
    attn = jnp.einsum("bdo,bdh->boh", a, question)                         # (B,1,H)
    x = jnp.concatenate([context[:, None, :], attn], axis=2)[:, 0]         # (B,2H)
    h0, c0 = hidden[0], mem[0]
    gates = x @ p["w_ih"].T + p["b_ih"] + h0 @ p["w_hh"].T + p["b_hh"]
    i = jax.nn.sigmoid(gates[:, :H])
    f = jax.nn.sigmoid(gates[:, H:2 * H])
    g = jnp.tanh(gates[:, 2 * H:3 * H])
    o = jax.nn.sigmoid(gates[:, 3 * H:])
    c1 = f * c0 + i * g
    h1 = o * jnp.tanh(c1)
    return h1[:, None, :], c1[None]


def _run_case(B, d, H, case_idx):
    key = jax.random.fold_in(jax.random.PRNGKey(0), case_idx)
    ks = jax.random.split(key, 14)

    context = jax.random.normal(ks[0], (B, H), jnp.float32)
    question = jax.random.normal(ks[1], (B, d, H), jnp.float32)
    hidden = jax.random.normal(ks[2], (1, B, H), jnp.float32)
    mem = jax.random.normal(ks[3], (1, B, H), jnp.float32)

    s = 0.1
    params = {
        "wg1": s * jax.random.normal(ks[4], (H, H), jnp.float32),
        "wg2": s * jax.random.normal(ks[5], (H, H), jnp.float32),
        "bg2": s * jax.random.normal(ks[6], (H,), jnp.float32),
        "wg3": s * jax.random.normal(ks[7], (H, H), jnp.float32),
        "wg4": s * jax.random.normal(ks[8], (1, H), jnp.float32),
        "bg4": s * jax.random.normal(ks[9], (1,), jnp.float32),
        "w_ih": s * jax.random.normal(ks[10], (4 * H, 2 * H), jnp.float32),
        "w_hh": s * jax.random.normal(ks[11], (4 * H, H), jnp.float32),
        "b_ih": s * jax.random.normal(ks[12], (4 * H,), jnp.float32),
        "b_hh": s * jax.random.normal(ks[13], (4 * H,), jnp.float32),
    }

    out, mem_new = decoder_forward(context, question, hidden, mem, params)
    jax.block_until_ready((out, mem_new))

    ref_out, ref_mem = _reference(context, question, hidden, mem, params)
    assert out.shape == (B, 1, H) and mem_new.shape == (1, B, H)
    assert np.allclose(np.asarray(out), np.asarray(ref_out), rtol=5e-2, atol=5e-2)
    assert np.allclose(np.asarray(mem_new), np.asarray(ref_mem), rtol=5e-2, atol=5e-2)


if __name__ == "__main__":
    _run_case(2, 8, 32, 0)    # small primary shape (single batch tile)
    _run_case(20, 5, 64, 1)   # multi-step grid + batch/question padding paths
    print("KERNEL_OK")
</pallas_src>

<mosaic_0001>
module attributes {stable_mosaic.version = 11 : i64} {
  func.func @_decoder_kernel(%arg0: i32, %arg1: memref<8x64xbf16, #tpu.memory_space<vmem>>, %arg2: memref<8x16x32xbf16, #tpu.memory_space<vmem>>, %arg3: memref<8x32xf32, #tpu.memory_space<vmem>>, %arg4: memref<32x32xbf16, #tpu.memory_space<vmem>>, %arg5: memref<64x32xbf16, #tpu.memory_space<vmem>>, %arg6: memref<1x32xf32, #tpu.memory_space<vmem>>, %arg7: memref<1x32xf32, #tpu.memory_space<vmem>>, %arg8: memref<64x128xbf16, #tpu.memory_space<vmem>>, %arg9: memref<32x128xbf16, #tpu.memory_space<vmem>>, %arg10: memref<1x128xf32, #tpu.memory_space<vmem>>, %arg11: memref<8x32xf32, #tpu.memory_space<vmem>>, %arg12: memref<8x32xf32, #tpu.memory_space<vmem>>) attributes {dimension_semantics = [#tpu.dimension_semantics<parallel>], iteration_bounds = array<i64: 1>, scalar_prefetch = 0 : i64, scratch_operands = 0 : i64, tpu.core_type = #tpu.core_type<tc>, window_params = [{transform_indices = @transform_0, window_bounds = array<i64: 8, 64>}, {transform_indices = @transform_1, window_bounds = array<i64: 8, 16, 32>}, {transform_indices = @transform_2, window_bounds = array<i64: 8, 32>}, {pipeline_mode = #tpu.pipeline_mode<synchronous>, transform_indices = @transform_3, window_bounds = array<i64: 32, 32>}, {pipeline_mode = #tpu.pipeline_mode<synchronous>, transform_indices = @transform_4, window_bounds = array<i64: 64, 32>}, {pipeline_mode = #tpu.pipeline_mode<synchronous>, transform_indices = @transform_5, window_bounds = array<i64: 1, 32>}, {pipeline_mode = #tpu.pipeline_mode<synchronous>, transform_indices = @transform_6, window_bounds = array<i64: 1, 32>}, {pipeline_mode = #tpu.pipeline_mode<synchronous>, transform_indices = @transform_7, window_bounds = array<i64: 64, 128>}, {pipeline_mode = #tpu.pipeline_mode<synchronous>, transform_indices = @transform_8, window_bounds = array<i64: 32, 128>}, {pipeline_mode = #tpu.pipeline_mode<synchronous>, transform_indices = @transform_9, window_bounds = array<i64: 1, 128>}, {transform_indices = @transform_10, window_bounds = array<i64: 8, 32>}, {transform_indices = @transform_11, window_bounds = array<i64: 8, 32>}]} {
    %c0 = arith.constant 0 : index
    %c0_0 = arith.constant 0 : index
    %0 = vector.load %arg1[%c0, %c0_0] : memref<8x64xbf16, #tpu.memory_space<vmem>>, vector<8x64xbf16>
    %c0_1 = arith.constant 0 : index
    %c0_2 = arith.constant 0 : index
    %c0_3 = arith.constant 0 : index
    %1 = vector.load %arg2[%c0_1, %c0_2, %c0_3] : memref<8x16x32xbf16, #tpu.memory_space<vmem>>, vector<8x16x32xbf16>
    %c0_4 = arith.constant 0 : index
    %c0_5 = arith.constant 0 : index
    %2 = vector.load %arg5[%c0_4, %c0_5] : memref<64x32xbf16, #tpu.memory_space<vmem>>, vector<64x32xbf16>
    %cst = arith.constant dense<0.000000e+00> : vector<8x32xf32>
    %3 = tpu.matmul %0, %2, %cst {dimension_numbers = #tpu.dot_dimension_numbers<[1], [0], [0], [1], [0, 0, 1, 1], [], []>} : vector<8x64xbf16>, vector<64x32xbf16>, vector<8x32xf32> -> vector<8x32xf32>
    %c0_6 = arith.constant 0 : index
    %c0_7 = arith.constant 0 : index
    %4 = vector.load %arg6[%c0_6, %c0_7] : memref<1x32xf32, #tpu.memory_space<vmem>>, vector<1x32xf32>
    %5 = vector.broadcast %4 : vector<1x32xf32> to vector<8x32xf32>
    %6 = arith.addf %3, %5 : vector<8x32xf32>
    %7 = vector.shape_cast %1 : vector<8x16x32xbf16> to vector<128x32xbf16>
    %c0_8 = arith.constant 0 : index
    %c0_9 = arith.constant 0 : index
    %8 = vector.load %arg4[%c0_8, %c0_9] : memref<32x32xbf16, #tpu.memory_space<vmem>>, vector<32x32xbf16>
    %cst_10 = arith.constant dense<0.000000e+00> : vector<128x32xf32>
    %9 = tpu.matmul %7, %8, %cst_10 {dimension_numbers = #tpu.dot_dimension_numbers<[1], [0], [0], [1], [0, 0, 1, 1], [], []>} : vector<128x32xbf16>, vector<32x32xbf16>, vector<128x32xf32> -> vector<128x32xf32>
    %10 = vector.shape_cast %9 : vector<128x32xf32> to vector<8x16x32xf32>
    %11 = vector.shape_cast %6 : vector<8x32xf32> to vector<8x1x32xf32>
    %12 = vector.broadcast %11 : vector<8x1x32xf32> to vector<8x16x32xf32>
    %13 = arith.addf %10, %12 : vector<8x16x32xf32>
    %14 = math.tanh %13 : vector<8x16x32xf32>
    %c0_11 = arith.constant 0 : index
    %c0_12 = arith.constant 0 : index
    %15 = vector.load %arg7[%c0_11, %c0_12] : memref<1x32xf32, #tpu.memory_space<vmem>>, vector<1x32xf32>
    %16 = vector.shape_cast %15 : vector<1x32xf32> to vector<1x1x32xf32>
    %17 = vector.broadcast %16 : vector<1x1x32xf32> to vector<8x16x32xf32>
    %18 = arith.mulf %14, %17 : vector<8x16x32xf32>
    %cst_13 = arith.constant dense<0.000000e+00> : vector<8x16xf32>
    %19 = vector.multi_reduction <add>, %18, %cst_13 [2] : vector<8x16x32xf32> to vector<8x16xf32>
    %20 = tpu.iota {dimensions = array<i32: 1>} : vector<8x16xi32>
    %c8_i32 = arith.constant 8 : i32
    %21 = vector.broadcast %c8_i32 : i32 to vector<8x16xi32>
    %22 = arith.cmpi slt, %20, %21 : vector<8x16xi32>
    %cst_14 = arith.constant -1.000000e+30 : f32
    %23 = vector.broadcast %cst_14 : f32 to vector<8x16xf32>
    %24 = arith.select %22, %19, %23 : vector<8x16xi1>, vector<8x16xf32>
    %cst_15 = arith.constant dense<0xFF800000> : vector<8xf32>
    %25 = vector.multi_reduction <maximumf>, %24, %cst_15 [1] : vector<8x16xf32> to vector<8xf32>
    %26 = vector.shape_cast %25 : vector<8xf32> to vector<8x1xf32>
    %27 = vector.broadcast %26 : vector<8x1xf32> to vector<8x16xf32>
    %28 = arith.subf %24, %27 : vector<8x16xf32>
    %29 = math.exp %28 : vector<8x16xf32>
    %cst_16 = arith.constant dense<0.000000e+00> : vector<8xf32>
    %30 = vector.multi_reduction <add>, %29, %cst_16 [1] : vector<8x16xf32> to vector<8xf32>
    %31 = vector.shape_cast %30 : vector<8xf32> to vector<8x1xf32>
    %32 = tpu.reciprocal %31 {approx = true} : vector<8x1xf32> -> vector<8x1xf32>
    %33 = vector.broadcast %32 : vector<8x1xf32> to vector<8x16xf32>
    %34 = arith.mulf %29, %33 : vector<8x16xf32>
    %35 = vector.shape_cast %34 : vector<8x16xf32> to vector<8x16x1xf32>
    %36 = arith.extf %1 : vector<8x16x32xbf16> to vector<8x16x32xf32>
    %37 = vector.broadcast %35 : vector<8x16x1xf32> to vector<8x16x32xf32>
    %38 = arith.mulf %37, %36 : vector<8x16x32xf32>
    %cst_17 = arith.constant dense<0.000000e+00> : vector<8x32xf32>
    %39 = vector.multi_reduction <add>, %38, %cst_17 [1] : vector<8x16x32xf32> to vector<8x32xf32>
    %c0_18 = arith.constant 0 : index
    %c0_19 = arith.constant 0 : index
    %40 = vector.load %arg8[%c0_18, %c0_19] : memref<64x128xbf16, #tpu.memory_space<vmem>>, vector<64x128xbf16>
    %cst_20 = arith.constant dense<0.000000e+00> : vector<8x128xf32>
    %41 = tpu.matmul %0, %40, %cst_20 {dimension_numbers = #tpu.dot_dimension_numbers<[1], [0], [0], [1], [0, 0, 1, 1], [], []>} : vector<8x64xbf16>, vector<64x128xbf16>, vector<8x128xf32> -> vector<8x128xf32>
    %42 = arith.truncf %39 : vector<8x32xf32> to vector<8x32xbf16>
    %c0_21 = arith.constant 0 : index
    %c0_22 = arith.constant 0 : index
    %43 = vector.load %arg9[%c0_21, %c0_22] : memref<32x128xbf16, #tpu.memory_space<vmem>>, vector<32x128xbf16>
    %cst_23 = arith.constant dense<0.000000e+00> : vector<8x128xf32>
    %44 = tpu.matmul %42, %43, %cst_23 {dimension_numbers = #tpu.dot_dimension_numbers<[1], [0], [0], [1], [0, 0, 1, 1], [], []>} : vector<8x32xbf16>, vector<32x128xbf16>, vector<8x128xf32> -> vector<8x128xf32>
    %45 = arith.addf %41, %44 : vector<8x128xf32>
    %c0_24 = arith.constant 0 : index
    %c0_25 = arith.constant 0 : index
    %46 = vector.load %arg10[%c0_24, %c0_25] : memref<1x128xf32, #tpu.memory_space<vmem>>, vector<1x128xf32>
    %47 = vector.broadcast %46 : vector<1x128xf32> to vector<8x128xf32>
    %48 = arith.addf %45, %47 : vector<8x128xf32>
    %49 = vector.extract_strided_slice %48 {offsets = [0, 0], sizes = [8, 32], strides = [1, 1]} : vector<8x128xf32> to vector<8x32xf32>
    %50 = arith.negf %49 : vector<8x32xf32>
    %51 = math.exp %50 : vector<8x32xf32>
    %cst_26 = arith.constant 1.000000e+00 : f32
    %52 = vector.broadcast %cst_26 : f32 to vector<8x32xf32>
    %53 = arith.addf %52, %51 : vector<8x32xf32>
    %54 = arith.divf %52, %53 : vector<8x32xf32>
    %55 = vector.extract_strided_slice %48 {offsets = [0, 32], sizes = [8, 32], strides = [1, 1]} : vector<8x128xf32> to vector<8x32xf32>
    %56 = arith.negf %55 : vector<8x32xf32>
    %57 = math.exp %56 : vector<8x32xf32>
    %cst_27 = arith.constant 1.000000e+00 : f32
    %58 = vector.broadcast %cst_27 : f32 to vector<8x32xf32>
    %59 = arith.addf %58, %57 : vector<8x32xf32>
    %60 = arith.divf %58, %59 : vector<8x32xf32>
    %61 = vector.extract_strided_slice %48 {offsets = [0, 64], sizes = [8, 32], strides = [1, 1]} : vector<8x128xf32> to vector<8x32xf32>
    %62 = math.tanh %61 : vector<8x32xf32>
    %63 = vector.extract_strided_slice %48 {offsets = [0, 96], sizes = [8, 32], strides = [1, 1]} : vector<8x128xf32> to vector<8x32xf32>
    %64 = arith.negf %63 : vector<8x32xf32>
    %65 = math.exp %64 : vector<8x32xf32>
    %cst_28 = arith.constant 1.000000e+00 : f32
    %66 = vector.broadcast %cst_28 : f32 to vector<8x32xf32>
    %67 = arith.addf %66, %65 : vector<8x32xf32>
    %68 = arith.divf %66, %67 : vector<8x32xf32>
    %c0_29 = arith.constant 0 : index
    %c0_30 = arith.constant 0 : index
    %69 = vector.load %arg3[%c0_29, %c0_30] : memref<8x32xf32, #tpu.memory_space<vmem>>, vector<8x32xf32>
    %70 = arith.mulf %60, %69 : vector<8x32xf32>
    %71 = arith.mulf %54, %62 : vector<8x32xf32>
    %72 = arith.addf %70, %71 : vector<8x32xf32>
    %73 = math.tanh %72 : vector<8x32xf32>
    %74 = arith.mulf %68, %73 : vector<8x32xf32>
    %c0_31 = arith.constant 0 : index
    %c0_32 = arith.constant 0 : index
    %75 = vector.load %arg11[%c0_31, %c0_32] : memref<8x32xf32, #tpu.memory_space<vmem>>, vector<8x32xf32>
    tpu.vector_store %arg11[%c0_31, %c0_32], %74 {strides = array<i32>} : memref<8x32xf32, #tpu.memory_space<vmem>>, vector<8x32xf32>,
    %c0_33 = arith.constant 0 : index
    %c0_34 = arith.constant 0 : index
    %76 = vector.load %arg12[%c0_33, %c0_34] : memref<8x32xf32, #tpu.memory_space<vmem>>, vector<8x32xf32>
    tpu.vector_store %arg12[%c0_33, %c0_34], %72 {strides = array<i32>} : memref<8x32xf32, #tpu.memory_space<vmem>>, vector<8x32xf32>,
    return
  }
  func.func @transform_0(%arg0: i32) -> (i32, i32) {
    %c0_i32 = arith.constant 0 : i32
    %c0_i32_0 = arith.constant 0 : i32
    return %arg0, %c0_i32 : i32, i32
  }
  func.func @transform_1(%arg0: i32) -> (i32, i32, i32) {
    %c0_i32 = arith.constant 0 : i32
    %c0_i32_0 = arith.constant 0 : i32
    %c0_i32_1 = arith.constant 0 : i32
    return %arg0, %c0_i32, %c0_i32_0 : i32, i32, i32
  }
  func.func @transform_2(%arg0: i32) -> (i32, i32) {
    %c0_i32 = arith.constant 0 : i32
    %c0_i32_0 = arith.constant 0 : i32
    return %arg0, %c0_i32 : i32, i32
  }
  func.func @transform_3(%arg0: i32) -> (i32, i32) {
    %c0_i32 = arith.constant 0 : i32
    %c0_i32_0 = arith.constant 0 : i32
    %c0_i32_1 = arith.constant 0 : i32
    return %c0_i32, %c0_i32_0 : i32, i32
  }
  func.func @transform_4(%arg0: i32) -> (i32, i32) {
    %c0_i32 = arith.constant 0 : i32
    %c0_i32_0 = arith.constant 0 : i32
    %c0_i32_1 = arith.constant 0 : i32
    return %c0_i32, %c0_i32_0 : i32, i32
  }
  func.func @transform_5(%arg0: i32) -> (i32, i32) {
    %c0_i32 = arith.constant 0 : i32
    %c0_i32_0 = arith.constant 0 : i32
    %c0_i32_1 = arith.constant 0 : i32
    return %c0_i32, %c0_i32_0 : i32, i32
  }
  func.func @transform_6(%arg0: i32) -> (i32, i32) {
    %c0_i32 = arith.constant 0 : i32
    %c0_i32_0 = arith.constant 0 : i32
    %c0_i32_1 = arith.constant 0 : i32
    return %c0_i32, %c0_i32_0 : i32, i32
  }
  func.func @transform_7(%arg0: i32) -> (i32, i32) {
    %c0_i32 = arith.constant 0 : i32
    %c0_i32_0 = arith.constant 0 : i32
    %c0_i32_1 = arith.constant 0 : i32
    return %c0_i32, %c0_i32_0 : i32, i32
  }
  func.func @transform_8(%arg0: i32) -> (i32, i32) {
    %c0_i32 = arith.constant 0 : i32
    %c0_i32_0 = arith.constant 0 : i32
    %c0_i32_1 = arith.constant 0 : i32
    return %c0_i32, %c0_i32_0 : i32, i32
  }
  func.func @transform_9(%arg0: i32) -> (i32, i32) {
    %c0_i32 = arith.constant 0 : i32
    %c0_i32_0 = arith.constant 0 : i32
    %c0_i32_1 = arith.constant 0 : i32
    return %c0_i32, %c0_i32_0 : i32, i32
  }
  func.func @transform_10(%arg0: i32) -> (i32, i32) {
    %c0_i32 = arith.constant 0 : i32
    %c0_i32_0 = arith.constant 0 : i32
    return %arg0, %c0_i32 : i32, i32
  }
  func.func @transform_11(%arg0: i32) -> (i32, i32) {
    %c0_i32 = arith.constant 0 : i32
    %c0_i32_0 = arith.constant 0 : i32
    return %arg0, %c0_i32 : i32, i32
  }
}

</mosaic_0001>

<bundles_post_ra>
// kernel: tpu_custom_call.1
= control target key start
LH: loop header
LB: loop body
LE: loop exit
PB: predicated region body
PF: predicated region fallthrough
CT: control target
= control target key end

     0   :  { %17 = vsyncpa [#allocation3], 0  ;;  %s1768_s0 = inlined_call_operand.hbm [shape: bf16[8,64], index: 0, kind: input, shape index: {}]   ;;  %s1769_s1 = inlined_call_operand.hbm [shape: bf16[8,16,32], index: 1, kind: input, shape index: {}]   ;;  %s1770_s2 = inlined_call_operand.hbm [shape: f32[8,32], index: 2, kind: input, shape index: {}]   ;;  %s1771_s3 = inlined_call_operand.vmem [shape: bf16[32,32], index: 3, kind: input, shape index: {}]   ;;  %s1772_s4 = inlined_call_operand.vmem [shape: bf16[64,32], index: 4, kind: input, shape index: {}]   ;;  %s1773_s5 = inlined_call_operand.vmem [shape: f32[1,32], index: 5, kind: input, shape index: {}]   ;;  %s1774_s6 = inlined_call_operand.vmem [shape: f32[1,32], index: 6, kind: input, shape index: {}]   ;;  %s1775_s7 = inlined_call_operand.vmem [shape: bf16[64,128], index: 7, kind: input, shape index: {}]   ;;  %s1776_s8 = inlined_call_operand.vmem [shape: bf16[32,128], index: 8, kind: input, shape index: {}]   ;;  %s1777_s9 = inlined_call_operand.vmem [shape: f32[1,128], index: 9, kind: input, shape index: {}]   ;;  %s1778_s10 = inlined_call_operand.hbm [shape: f32[8,32], index: 10, kind: output, shape index: {0}]   ;;  %s1779_s11 = inlined_call_operand.hbm [shape: f32[8,32], index: 11, kind: output, shape index: {1}]  }
   0x1   :  { %18 = vsyncpa [#allocation6], 0 }
   0x2   :  { %19 = vsyncpa [#allocation4], 0 }
   0x3   :  { %20 = vsyncpa [#allocation10], 0  ;;  %s1413_s17 = smov [#allocation5]   ;;  %s1295_s21 = scalar_lea.hbm %s1769_s1, 1024 }
   0x4   :  { %s36_s18 = sshll.u32 %s1413_s17, 4  ;;  %p1296_p0 = scmp.ne.s32.totalorder %s1769_s1, %s1295_s21  ;;  %s37_s18 = int_to_ptr.vmem [resolvable:$true] %s36_s18 }
   0x5   :  { %p1299_p1 = scmp.lt.u32.totalorder %s1295_s21, %s1769_s1 }
   0x7   :  { %p1301_p2 = pnand %p1299_p1, %p1296_p0 }
   0x9   :  { %1304 = shalt.err (!%p1301_p2)
}
   0xa   :  { %s1305_s26 = scalar_lea.vmem %s37_s18, 1024  ;;  %p1310_p4 = scmp.lt.s32.totalorder %s37_s18, %s37_s18 }
   0xb   :  { %p1306_p3 = scmp.ne.s32.totalorder %s37_s18, %s1305_s26  ;;  %p1311_p5 = scmp.lt.s32.totalorder %s1305_s26, %s1305_s26 }
   0xd   :  { %p1312_p6 = por %p1311_p5, %p1310_p4 }
   0xf   :  { %p1313_p7 = pnand %p1312_p6, %p1306_p3 }
  0x11   :  { %1316 = shalt.err (!%p1313_p7)
}
  0x12   :  { %s1414_s27 = smov 64   ;;  %s1415_s28 = smov 4  }
  0x13   :  { %42 = dma.hbm_to_vmem [thread:$0]  %s1769_s1, 1024, %s37_s18, [#allocation6], %s1414_s27, %s1414_s27, %s1415_s28  }
  0x14   :  { %s1416_s12 = smov [#allocation2]   ;;  %s1417_s14 = smov [#allocation7]  }
  0x15   :  { %s27_s13 = sshll.u32 %s1416_s12, 4  ;;  %s49_s15 = sshll.u32 %s1417_s14, 4  ;;  %s28_s13 = int_to_ptr.vmem [resolvable:$true] %s27_s13  ;;  %s50_s15 = int_to_ptr.vmem [resolvable:$true] %s49_s15 }
  0x16   :  { %s1317_s19 = scalar_lea.hbm %s1768_s0, 64 }
  0x17   :  { %p1318_p8 = scmp.ne.s32.totalorder %s1768_s0, %s1317_s19  ;;  %p1321_p9 = scmp.lt.u32.totalorder %s1317_s19, %s1768_s0 }
  0x19   :  { %p1323_p10 = pnand %p1321_p9, %p1318_p8 }
  0x1b   :  { %1326 = shalt.err (!%p1323_p10)
}
  0x1c   :  { %s1327_s1 = scalar_lea.vmem %s28_s13, 64  ;;  %p1332_p12 = scmp.lt.s32.totalorder %s28_s13, %s28_s13 }
  0x1d   :  { %p1328_p11 = scmp.ne.s32.totalorder %s28_s13, %s1327_s1  ;;  %p1333_p13 = scmp.lt.s32.totalorder %s1327_s1, %s1327_s1 }
  0x1f   :  { %p1334_p0 = por %p1333_p13, %p1332_p12 }
  0x21   :  { %p1335_p1 = pnand %p1334_p0, %p1328_p11 }
  0x23   :  { %1338 = shalt.err (!%p1335_p1)
}
  0x24   :  { %30 = dma.hbm_to_vmem [thread:$0]  %s1768_s0, 64, %s28_s13, [#allocation3]  }
  0x25   :  { %s1339_s28 = scalar_lea.hbm %s1770_s2, 128 }
  0x26   :  { %p1340_p2 = scmp.ne.s32.totalorder %s1770_s2, %s1339_s28  ;;  %p1343_p3 = scmp.lt.u32.totalorder %s1339_s28, %s1770_s2 }
  0x28   :  { %p1345_p4 = pnand %p1343_p3, %p1340_p2 }
  0x2a   :  { %1348 = shalt.err (!%p1345_p4)
}
  0x2b   :  { %s1349_s16 = scalar_lea.vmem %s50_s15, 128  ;;  %p1354_p6 = scmp.lt.s32.totalorder %s50_s15, %s50_s15 }
  0x2c   :  { %p1350_p5 = scmp.ne.s32.totalorder %s50_s15, %s1349_s16  ;;  %p1355_p7 = scmp.lt.s32.totalorder %s1349_s16, %s1349_s16 }
  0x2e   :  { %p1356_p8 = por %p1355_p7, %p1354_p6 }
  0x30   :  { %p1357_p9 = pnand %p1356_p8, %p1350_p5 }
  0x32   :  { %1360 = shalt.err (!%p1357_p9)
}
  0x33   :  { %52 = dma.hbm_to_vmem [thread:$0]  %s1770_s2, 128, %s50_s15, [#allocation6]  }
  0x34   :  { %1405 = dma.done.wait [#allocation3], 64  }
  0x35   :  { %1406 = vsyncadd [#allocation3], 4294967232 }
  0x36   :  { %1407 = dma.done.wait [#allocation6], 1152  }
  0x37   :  { %1408 = vsyncadd [#allocation6], 4294966144  ;;  %v1418_v0 = vmov 0.0   ;;  %vm1419_vm0 = vmmov 0   ;;  %v1223_v1 = vld [vmem:[%s1772_s4] sm:$0xff]   ;;  %v1225_v3 = vld [vmem:[%s1772_s4 + $0x8] sm:$0xff]   ;;  %v360_v18 = vlaneseq }
  0x38   :  { %1159 = vmatprep.subr.bf16.mxu0 %v1418_v0  ;;  %1167 = vmatprep.mubr.msk.bf16.mxu0 %vm1419_vm0, %v1418_v0  ;;  %v1224_v2 = vld [vmem:[%s1771_s3] sm:$0xff]   ;;  %v1226_v4 = vld [vmem:[%s1771_s3 + $0x8] sm:$0xff]   ;;  %vm233_vm1 = vcmask 261120   ;;  %v1228_v7 = vld [vmem:[%s1772_s4 + $0x10] sm:$0xff]   ;;  %vm133_vm2 = vcmask 523264   ;;  %vm576_vm3 = vcmask 130112  }
  0x39   :  { %1160 = vmatpush3.bf16.msra.mxu0 %v1223_v1  ;;  %1171 = vmatprep.subr.bf16.mxu1 %v1224_v2  ;;  %v1539_v5 = vld [vmem:[#allocation5] sm:$0xff]   ;;  %v1541_v6 = vld [vmem:[#allocation5 + $0x8] sm:$0xff]   ;;  %v1549_v8 = vld [vmem:[#allocation5 + $0x10] sm:$0xff]   ;;  %v1420_v16 = vmov 1966171168   ;;  %v1587_v21 = vshrl.u32 %v360_v18, 7 }
  0x3a   :  { %1161 = vmatprep.subr.bf16.mxu0 %v1418_v0  ;;  %1172 = vmatpush3.bf16.msra.mxu1 %v1224_v2  ;;  %v1230_v9 = vld [vmem:[%s1772_s4 + $0x18] sm:$0xff]   ;;  %v1561_v11 = vld [vmem:[#allocation5 + $0x20] sm:$0xff]   ;;  %v1563_v12 = vld [vmem:[#allocation2] sm:$0xf]  ;;  %v358_v17 = vunpack.c.l.s4 %v1420_v16  ;;  %vm641_vm4 = vcmask 1041409   ;;  %vm643_vm5 = vcmask 1042434  }
  0x3b   :  { %1173 = vmatprep.subr.bf16.mxu1 %v1226_v4  ;;  %1175 = vmatprep.mubr.msk.bf16.mxu1 %vm233_vm1, %v1539_v5  ;;  %v1554_v10 = vld [vmem:[#allocation5 + $0x18] sm:$0xff]   ;;  %v1574_v13 = vld [vmem:[#allocation5 + $0x28] sm:$0xff]   ;;  %v1576_v14 = vld [vmem:[#allocation5 + $0x30] sm:$0xff]   ;;  %v1594_v34 = vsub.s32 0, %v1587_v21  ;;  %vm645_vm6 = vcmask 1043459   ;;  %vm647_vm7 = vcmask 1044484  }
  0x3c   :  { %v1582_v15 = vld [vmem:[#allocation5 + $0x38] sm:$0xff]   ;;  %v359_v20 = vunpack.c.0.s8 %v358_v17  ;;  %vm649_vm8 = vcmask 1045509   ;;  %vm651_vm9 = vcmask 1046534   ;;  %vm653_vm10 = vcmask 1047559   ;;  %s1421_s12 = smov 32  }
  0x3d   :  { %1162 = vmatpush3.bf16.msra.mxu0 %v1225_v3  ;;  %v1101_v25 = vld [vmem:[%s1773_s5] ss:$0 sm:$0xff]  ;;  %vm657_vm12 = vcmask 130048  }
  0x3e   :  { %1163 = vmatprep.subr.bf16.mxu0 %v1418_v0  ;;  %1174 = vmatpush3.bf16.msra.mxu1 %v1226_v4  ;;  %v362_v26 = vsub.s32 %v359_v20, %v1587_v21 }
  0x41   :  { %1164 = vmatpush3.bf16.msra.mxu0 %v1228_v7  ;;  %1176 = vmatmul.mubr.msk.bf16.vlgmr.msra.gmra.mrb[0].mxu1 %vm233_vm1, %v1541_v6 }
  0x42   :  { %1165 = vmatprep.subr.bf16.mxu0 %v1418_v0  ;;  %1179 = vmatprep.mubr.msk.bf16.mxu1 %vm233_vm1, %v1549_v8 }
  0x45   :  { %1166 = vmatpush3.bf16.msra.mxu0 %v1230_v9 }
  0x46   :  { %1191 = vmatprep.subr.bf16.mxu0 %v1418_v0 }
  0x48   :  { %1168 = vmatmul.mubr.msk.bf16.vlgmr.msra.gmra.mrb[0].mxu0 %vm133_vm2, %v1563_v12 }
  0x49   :  { %1195 = vmatprep.mubr.msk.bf16.mxu0 %vm1419_vm0, %v1418_v0  ;;  %1180 = vmatmul.mubr.msk.bf16.gmra.mrb[4].mxu1 %vm233_vm1, %v1554_v10 }
  0x4a   :  { %1183 = vmatprep.mubr.msk.bf16.mxu1 %vm233_vm1, %v1561_v11 }
  0x51   :  { %1184 = vmatmul.mubr.msk.bf16.gmra.mrb[8].mxu1 %vm233_vm1, %v1574_v13 }
  0x52   :  { %1187 = vmatprep.mubr.msk.bf16.mxu1 %vm233_vm1, %v1576_v14 }
  0x59   :  { %1188 = vmatmul.mubr.msk.bf16.gmra.mrb[12].mxu1 %vm233_vm1, %v1582_v15 }
 0x114   :  { %v1177_v19 = vpop.f32.mrb[0].mxu1 }
 0x115   :  { %v292_v22 = vpop.f32.mrb[1].mxu1 }
 0x116   :  { %v1178_v23 = vpop.f32.mrb[2].mxu1 }
 0x117   :  { %v295_v24 = vpop.f32.mrb[3].mxu1 }
 0x11b   :  { %v171_v27 = vpop.f32.mrb[0].mxu0 }
 0x11c   :  { %v172_v28 = vadd.f32 %v1101_v25, %v171_v27  ;;  %v1169_v29 = vpop.f32.mrb[1].mxu0  ;;  %v1181_v31 = vpop.f32.mrb[4].mxu1  ;;  %v1607_v25 = vld [vmem:[%s1774_s6] ss:$0 sm:$0xff] }
 0x11d   :  { %v174_v30 = vpop.f32.mrb[2].mxu0  ;;  %v308_v36 = vpop.f32.mrb[5].mxu1 }
 0x11e   :  { %v356_v32 = vcombine.high %v172_v28, %v172_v28  ;;  %v363_v33 = vrot.slane %v172_v28, %v362_v26  ;;  %v1170_v35 = vpop.f32.mrb[3].mxu0  ;;  %v1182_v37 = vpop.f32.mrb[6].mxu1 }
 0x11f   :  { %v311_v41 = vpop.f32.mrb[7].mxu1 }
 0x120   :  { %v370_v38 = vrot.slane %v356_v32, %v362_v26  ;;  %v371_v39 = vcombine.high %v363_v33, %v363_v33  ;;  %v379_v40 = vrot.slane %v363_v33, %v362_v26 }
 0x122   :  { %v393_v42 = vrot.slane %v371_v39, %v362_v26  ;;  %v408_v43 = vrot.slane %v379_v40, %v1594_v34  ;;  %v401_v44 = vcombine.high %v379_v40, %v379_v40  ;;  %v372_v45 = vcombine.high %v370_v38, %v370_v38 }
 0x123   :  { %v386_v46 = vrot.slane %v370_v38, %v362_v26 }
 0x124   :  { %v412_v47 = vrot.slane %v393_v42, %v1594_v34  ;;  %v445_v48 = vadd.f32 %v408_v43, %v292_v22  ;;  %v446_v49 = vadd.f32 %v408_v43, %v295_v24  ;;  %v403_v50 = vcombine.high %v393_v42, %v393_v42  ;;  %v1185_v52 = vpop.f32.mrb[8].mxu1 }
 0x125   :  { %v416_v51 = vrot.slane %v401_v44, %v1594_v34  ;;  %v400_v53 = vrot.slane %v372_v45, %v362_v26  ;;  %v424_v54 = vrot.slane %v386_v46, %v1594_v34  ;;  %v402_v55 = vcombine.high %v386_v46, %v386_v46  ;;  %v324_v59 = vpop.f32.mrb[9].mxu1 }
 0x126   :  { %v447_v56 = vadd.f32 %v1177_v19, %v412_v47  ;;  %1251 = vtanh.f32 %v445_v48  ;;  %v448_v57 = vadd.f32 %v1178_v23, %v412_v47  ;;  %v420_v58 = vrot.slane %v403_v50, %v1594_v34  ;;  %v1186_v63 = vpop.f32.mrb[10].mxu1 }
 0x127   :  { %1253 = vtanh.f32 %v446_v49  ;;  %v449_v60 = vadd.f32 %v416_v51, %v308_v36  ;;  %v450_v61 = vadd.f32 %v416_v51, %v311_v41  ;;  %v428_v62 = vrot.slane %v400_v53, %v1594_v34  ;;  %v327_v4 = vpop.f32.mrb[11].mxu1 }
 0x128   :  { %1255 = vtanh.f32 %v447_v56  ;;  %v451_v1 = vadd.f32 %v1181_v31, %v420_v58  ;;  %v452_v2 = vadd.f32 %v1182_v37, %v420_v58  ;;  %v453_v3 = vadd.f32 %v424_v54, %v324_v59 }
 0x129   :  { %1257 = vtanh.f32 %v448_v57  ;;  %v455_v7 = vadd.f32 %v1185_v52, %v428_v62  ;;  %v456_v9 = vadd.f32 %v1186_v63, %v428_v62  ;;  %v454_v16 = vadd.f32 %v424_v54, %v327_v4 }
 0x12a   :  { %v404_v17 = vcombine.high %v400_v53, %v400_v53  ;;  %1259 = vtanh.f32 %v449_v60  ;;  %v432_v22 = vrot.slane %v402_v55, %v1594_v34 }
 0x12b   :  { %1261 = vtanh.f32 %v450_v61 }
 0x12c   :  { %v436_v19 = vrot.slane %v404_v17, %v1594_v34  ;;  %v1189_v20 = vpop.f32.mrb[12].mxu1  ;;  %1263 = vtanh.f32 %v453_v3 }
 0x12d   :  { %v340_v24 = vpop.f32.mrb[13].mxu1  ;;  %1265 = vtanh.f32 %v452_v2 }
 0x12e   :  { %v459_v23 = vadd.f32 %v1189_v20, %v436_v19  ;;  %v457_v26 = vadd.f32 %v432_v22, %v340_v24  ;;  %v1190_v27 = vpop.f32.mrb[14].mxu1  ;;  %1267 = vtanh.f32 %v451_v1 }
 0x12f   :  { %v460_v29 = vadd.f32 %v1190_v27, %v436_v19  ;;  %v343_v30 = vpop.f32.mrb[15].mxu1  ;;  %1269 = vtanh.f32 %v454_v16 }
 0x130   :  { %v1252_v28 = vpop.eup %1251  ;;  %v458_v32 = vadd.f32 %v432_v22, %v343_v30  ;;  %1271 = vtanh.f32 %v455_v7 }
 0x131   :  { %v1254_v31 = vpop.eup %1253  ;;  %v484_v33 = vmul.f32 %v1252_v28, %v1607_v25  ;;  %1273 = vtanh.f32 %v456_v9 }
 0x132   :  { %v1256_v35 = vpop.eup %1255  ;;  %v485_v39 = vmul.f32 %v1254_v31, %v1607_v25  ;;  %1275 = vtanh.f32 %v457_v26 }
 0x133   :  { %v1258_v36 = vpop.eup %1257  ;;  %v500_v37 = vsel %vm233_vm1, %v484_v33, 0.0  ;;  %v486_v38 = vmul.f32 %v1256_v35, %v1607_v25  ;;  %1277 = vtanh.f32 %v458_v32 }
 0x134   :  { %501 = vadd.xlane.f32.xlu0 %v500_v37  ;;  %v1260_v40 = vpop.eup %1259  ;;  %v487_v42 = vmul.f32 %v1258_v36, %v1607_v25  ;;  %v503_v44 = vsel %vm233_vm1, %v485_v39, 0.0  ;;  %1279 = vtanh.f32 %v459_v23  ;;  %v549_v36 = vand.u32 127, %v360_v18 }
 0x135   :  { %v506_v41 = vsel %vm233_vm1, %v486_v38, 0.0  ;;  %v1262_v43 = vpop.eup %1261  ;;  %v488_v45 = vmul.f32 %v1260_v40, %v1607_v25  ;;  %1281 = vtanh.f32 %v460_v29 }
 0x136   :  { %507 = vadd.xlane.f32.xlu1 %v506_v41  ;;  %v1264_v46 = vpop.eup %1263  ;;  %v509_v47 = vsel %vm233_vm1, %v487_v42, 0.0  ;;  %v489_v48 = vmul.f32 %v1262_v43, %v1607_v25  ;;  %v571_v38 = vadd.s32 4294967288, %v549_v36  ;;  %v569_v42 = vsub.s32 %v549_v36, %v1587_v21 }
 0x137   :  { %v1266_v49 = vpop.eup %1265  ;;  %v512_v50 = vsel %vm233_vm1, %v488_v45, 0.0  ;;  %v492_v51 = vmul.f32 %v1264_v46, %v1607_v25  ;;  %vm550_vm11 = vcmp.lt.s32.totalorder %v549_v36, 8 }
 0x138   :  { %504 = vadd.xlane.f32.xlu0 %v503_v44  ;;  %v1268_v52 = vpop.eup %1267  ;;  %v515_v53 = vsel %vm233_vm1, %v489_v48, 0.0  ;;  %v491_v54 = vmul.f32 %v1266_v49, %v1607_v25 }
 0x139   :  { %v1270_v55 = vpop.eup %1269  ;;  %v524_v56 = vsel %vm233_vm1, %v492_v51, 0.0  ;;  %v490_v57 = vmul.f32 %v1268_v52, %v1607_v25 }
 0x13a   :  { %510 = vadd.xlane.f32.xlu1 %v509_v47  ;;  %v1272_v58 = vpop.eup %1271  ;;  %v521_v59 = vsel %vm233_vm1, %v491_v54, 0.0  ;;  %v493_v60 = vmul.f32 %v1270_v55, %v1607_v25 }
 0x13b   :  { %v1274_v61 = vpop.eup %1273  ;;  %v518_v62 = vsel %vm233_vm1, %v490_v57, 0.0  ;;  %v494_v63 = vmul.f32 %v1272_v58, %v1607_v25 }
 0x13c   :  { %513 = vadd.xlane.f32.xlu0 %v512_v50  ;;  %v1276_v1 = vpop.eup %1275  ;;  %v527_v2 = vsel %vm233_vm1, %v493_v60, 0.0  ;;  %v495_v3 = vmul.f32 %v1274_v61, %v1607_v25 }
 0x13d   :  { %v1278_v4 = vpop.eup %1277  ;;  %v530_v7 = vsel %vm233_vm1, %v494_v63, 0.0  ;;  %v496_v9 = vmul.f32 %v1276_v1, %v1607_v25 }
 0x13e   :  { %516 = vadd.xlane.f32.xlu1 %v515_v53  ;;  %v1280_v16 = vpop.eup %1279  ;;  %v533_v17 = vsel %vm233_vm1, %v495_v3, 0.0  ;;  %v497_v19 = vmul.f32 %v1278_v4, %v1607_v25 }
 0x13f   :  { %v1282_v20 = vpop.eup %1281  ;;  %v536_v22 = vsel %vm233_vm1, %v496_v9, 0.0  ;;  %v498_v23 = vmul.f32 %v1280_v16, %v1607_v25 }
 0x140   :  { %525 = vadd.xlane.f32.xlu0 %v524_v56  ;;  %v539_v24 = vsel %vm233_vm1, %v497_v19, 0.0  ;;  %v499_v26 = vmul.f32 %v1282_v20, %v1607_v25  ;;  %v574_v25 = vsub.s32 %v571_v38, %v1587_v21 }
 0x141   :  { %v542_v27 = vsel %vm233_vm1, %v498_v23, 0.0 }
 0x142   :  { %522 = vadd.xlane.f32.xlu1 %v521_v59  ;;  %v545_v28 = vsel %vm233_vm1, %v499_v26, 0.0 }
 0x144   :  { %519 = vadd.xlane.f32.xlu0 %v518_v62 }
 0x146   :  { %528 = vadd.xlane.f32.xlu1 %v527_v2 }
 0x148   :  { %531 = vadd.xlane.f32.xlu0 %v530_v7 }
 0x14a   :  { %534 = vadd.xlane.f32.xlu1 %v533_v17 }
 0x14c   :  { %537 = vadd.xlane.f32.xlu0 %v536_v22 }
 0x14e   :  { %540 = vadd.xlane.f32.xlu1 %v539_v24 }
 0x150   :  { %543 = vadd.xlane.f32.xlu0 %v542_v27 }
 0x152   :  { %546 = vadd.xlane.f32.xlu1 %v545_v28 }
 0x1c1   :  { %v502_v29 = vpop.xlane.xlu0 %501 }
 0x1c2   :  { %v570_v51 = vrot.slane %v502_v29, %v569_v42 }
 0x1c3   :  { %v508_v30 = vpop.xlane.xlu1 %507 }
 0x1c4   :  { %v581_v46 = vrot.slane %v508_v30, %v569_v42 }
 0x1c5   :  { %v505_v31 = vpop.xlane.xlu0 %504 }
 0x1c6   :  { %v575_v47 = vrot.slane %v505_v31, %v574_v25 }
 0x1c7   :  { %v511_v32 = vpop.xlane.xlu1 %510 }
 0x1c8   :  { %v585_v43 = vrot.slane %v511_v32, %v574_v25  ;;  %v577_v56 = vsel %vm576_vm3, %v575_v47, %v570_v51 }
 0x1c9   :  { %v514_v33 = vpop.xlane.xlu0 %513 }
 0x1ca   :  { %v590_v49 = vrot.slane %v514_v33, %v569_v42  ;;  %v586_v18 = vsel %vm576_vm3, %v585_v43, %v581_v46  ;;  %v704_v43 = vsub.s32 3, %v1587_v21 }
 0x1cb   :  { %v517_v35 = vpop.xlane.xlu1 %516  ;;  %v642_v59 = vsel %vm641_vm4, %v586_v18, %v577_v56  ;;  %v1237_v18 = vld [vmem:[%s1776_s8] sm:$0xff]   ;;  %v757_v56 = vunpack.c.l.bf16 %v1539_v5 }
 0x1cc   :  { %v594_v44 = vrot.slane %v517_v35, %v574_v25  ;;  %1192 = vmatpush3.bf16.msra.mxu0 %v1237_v18 }
 0x1cd   :  { %v526_v37 = vpop.xlane.xlu0 %525  ;;  %1193 = vmatprep.subr.bf16.mxu0 %v1418_v0 }
 0x1ce   :  { %v595_v53 = vsel %vm576_vm3, %v594_v44, %v590_v49  ;;  %v608_v60 = vrot.slane %v526_v37, %v569_v42 }
 0x1cf   :  { %v523_v39 = vpop.xlane.xlu1 %522  ;;  %v644_v62 = vsel %vm643_vm5, %v595_v53, %v642_v59 }
 0x1d0   :  { %v603_v52 = vrot.slane %v523_v39, %v574_v25 }
 0x1d1   :  { %v520_v40 = vpop.xlane.xlu0 %519 }
 0x1d2   :  { %v599_v48 = vrot.slane %v520_v40, %v569_v42  ;;  %v682_v40 = vsub.s32 1, %v1587_v21 }
 0x1d3   :  { %v529_v41 = vpop.xlane.xlu1 %528 }
 0x1d4   :  { %v612_v54 = vrot.slane %v529_v41, %v574_v25  ;;  %v604_v57 = vsel %vm576_vm3, %v603_v52, %v599_v48  ;;  %v737_v48 = vsub.s32 6, %v1587_v21  ;;  %v1238_v52 = vld [vmem:[%s1776_s8 + $0x8] sm:$0xff]  }
 0x1d5   :  { %v532_v45 = vpop.xlane.xlu0 %531  ;;  %v646_v2 = vsel %vm645_vm6, %v604_v57, %v644_v62  ;;  %1194 = vmatpush3.bf16.msra.mxu0 %v1238_v52  ;;  %v759_v57 = vunpack.c.l.bf16 %v1541_v6 }
 0x1d6   :  { %v617_v63 = vrot.slane %v532_v45, %v569_v42  ;;  %v613_v3 = vsel %vm576_vm3, %v612_v54, %v608_v60  ;;  %v715_v45 = vsub.s32 4, %v1587_v21  ;;  %1199 = vmatprep.subr.bf16.mxu0 %v1418_v0  ;;  %v760_v60 = vunpack.c.h.bf16 %v1541_v6 }
 0x1d7   :  { %v535_v50 = vpop.xlane.xlu1 %534  ;;  %v648_v19 = vsel %vm647_vm7, %v613_v3, %v646_v2 }
 0x1d8   :  { %v621_v58 = vrot.slane %v535_v50, %v574_v25  ;;  %v748_v50 = vsub.s32 7, %v1587_v21 }
 0x1d9   :  { %v538_v55 = vpop.xlane.xlu0 %537 }
 0x1da   :  { %v626_v4 = vrot.slane %v538_v55, %v569_v42  ;;  %v622_v9 = vsel %vm576_vm3, %v621_v58, %v617_v63  ;;  %v758_v55 = vunpack.c.h.bf16 %v1539_v5  ;;  %v763_v5 = vunpack.c.l.bf16 %v1554_v10 }
 0x1db   :  { %v541_v61 = vpop.xlane.xlu1 %540  ;;  %v650_v23 = vsel %vm649_vm8, %v622_v9, %v648_v19 }
 0x1dc   :  { %v630_v1 = vrot.slane %v541_v61, %v574_v25 }
 0x1dd   :  { %v544_v7 = vpop.xlane.xlu0 %543 }
 0x1de   :  { %v631_v16 = vsel %vm576_vm3, %v630_v1, %v626_v4  ;;  %v635_v20 = vrot.slane %v544_v7, %v569_v42  ;;  %v761_v1 = vunpack.c.l.bf16 %v1549_v8  ;;  %v762_v7 = vunpack.c.h.bf16 %v1549_v8 }
 0x1df   :  { %v547_v17 = vpop.xlane.xlu1 %546  ;;  %v652_v26 = vsel %vm651_vm9, %v631_v16, %v650_v23 }
 0x1e0   :  { %v639_v22 = vrot.slane %v547_v17, %v574_v25  ;;  %v693_v25 = vsub.s32 2, %v1587_v21 }
 0x1e2   :  { %v640_v24 = vsel %vm576_vm3, %v639_v22, %v635_v20 }
 0x1e3   :  { %v654_v27 = vsel %vm653_vm10, %v640_v24, %v652_v26  ;;  %v764_v26 = vunpack.c.h.bf16 %v1554_v10 }
 0x1e4   :  { %v656_v28 = vsel %vm550_vm11, %v654_v27, -1e+30 }
 0x1e5   :  { %v658_v29 = vsel %vm657_vm12, %v656_v28, -inf }
 0x1e6   :  { %659 = vmax.xlane.f32.xlu0 %v658_v29 }
 0x273   :  { %v660_v30 = vpop.xlane.xlu0 %659 }
 0x274   :  { %v661_v31 = vsub.f32 %v656_v28, %v660_v30  ;;  %v765_v30 = vunpack.c.l.bf16 %v1561_v11 }
 0x276   :  { %v662_v32 = vmul.f32 1.442695, %v661_v31 }
 0x278   :  { %1283 = vpow2.f32 %v662_v32 }
 0x282   :  { %v1284_v33 = vpop.eup %1283 }
 0x283   :  { %v664_v35 = vsel %vm657_vm12, %v1284_v33, 0.0 }
 0x284   :  { %665 = vadd.xlane.f32.xlu1 %v664_v35 }
 0x311   :  { %v666_v36 = vpop.xlane.xlu1 %665 }
 0x312   :  { %1285 = vrcp.f32 %v666_v36 }
 0x31c   :  { %v1286_v37 = vpop.eup %1285 }
 0x31d   :  { %v668_v38 = vmul.f32 %v1286_v37, %v1284_v33  ;;  %v766_v37 = vunpack.c.h.bf16 %v1561_v11 }
 0x31f   :  { %v672_v39 = vrot.slane %v668_v38, %v1594_v34  ;;  %v683_v41 = vrot.slane %v668_v38, %v682_v40  ;;  %v694_v42 = vrot.slane %v668_v38, %v693_v25  ;;  %v705_v44 = vrot.slane %v668_v38, %v704_v43 }
 0x320   :  { %v716_v46 = vrot.slane %v668_v38, %v715_v45  ;;  %v726_v34 = vsub.s32 5, %v1587_v21  ;;  %v738_v49 = vrot.slane %v668_v38, %v737_v48  ;;  %v749_v51 = vrot.slane %v668_v38, %v748_v50  ;;  %v1039_v21 = vld [vmem:[#allocation7] sm:$0xff] }
 0x321   :  { %678 = vbcast.lane.b32.xlu1 %v672_v39, 264  ;;  %674 = vbcast.lane.b32.xlu0 %v672_v39, 256  ;;  %v767_v43 = vunpack.c.l.bf16 %v1574_v13 }
 0x322   :  { %v727_v47 = vrot.slane %v668_v38, %v726_v34  ;;  %v768_v34 = vunpack.c.h.bf16 %v1574_v13 }
 0x325   :  { %685 = vbcast.lane.b32.xlu1 %v683_v41, 256  ;;  %696 = vbcast.lane.b32.xlu0 %v694_v42, 256 }
 0x329   :  { %689 = vbcast.lane.b32.xlu1 %v683_v41, 264  ;;  %707 = vbcast.lane.b32.xlu0 %v705_v44, 256 }
 0x32d   :  { %700 = vbcast.lane.b32.xlu1 %v694_v42, 264  ;;  %718 = vbcast.lane.b32.xlu0 %v716_v46, 256 }
 0x331   :  { %711 = vbcast.lane.b32.xlu1 %v705_v44, 264  ;;  %729 = vbcast.lane.b32.xlu0 %v727_v47, 256 }
 0x335   :  { %722 = vbcast.lane.b32.xlu1 %v716_v46, 264  ;;  %740 = vbcast.lane.b32.xlu0 %v738_v49, 256 }
 0x339   :  { %733 = vbcast.lane.b32.xlu1 %v727_v47, 264  ;;  %751 = vbcast.lane.b32.xlu0 %v749_v51, 256 }
 0x33d   :  { %744 = vbcast.lane.b32.xlu1 %v738_v49, 264 }
 0x341   :  { %755 = vbcast.lane.b32.xlu1 %v749_v51, 264  ;;  %v769_v51 = vunpack.c.l.bf16 %v1576_v14 }
 0x345   :  { %1041 = vrot.lane.b32.xlu1 %v1039_v21, %s1421_s12 }
 0x393   :  { %v679_v53 = vpop.permute.xlu1 %678  ;;  %v675_v54 = vpop.permute.xlu0 %674 }
 0x394   :  { %v774_v61 = vmul.f32 %v758_v55, %v679_v53  ;;  %v773_v62 = vmul.f32 %v757_v56, %v675_v54 }
 0x396   :  { %v790_v9 = vsel %vm233_vm1, %v774_v61, 0.0  ;;  %v789_v16 = vsel %vm233_vm1, %v773_v62, 0.0  ;;  %v771_v62 = vunpack.c.l.bf16 %v1582_v15 }
 0x397   :  { %v686_v58 = vpop.permute.xlu1 %685  ;;  %v697_v59 = vpop.permute.xlu0 %696  ;;  %v791_v27 = vadd.f32 %v790_v9, %v789_v16  ;;  %v772_v16 = vunpack.c.h.bf16 %v1582_v15 }
 0x398   :  { %v775_v63 = vmul.f32 %v759_v57, %v686_v58  ;;  %v777_v19 = vmul.f32 %v761_v1, %v697_v59  ;;  %v770_v57 = vunpack.c.h.bf16 %v1576_v14 }
 0x399   :  { %v792_v38 = vrot.slane %v791_v27, 4 }
 0x39a   :  { %v798_v17 = vsel %vm233_vm1, %v775_v63, 0.0  ;;  %v807_v8 = vsel %vm233_vm1, %v777_v19, 0.0 }
 0x39b   :  { %v690_v2 = vpop.permute.xlu1 %689  ;;  %v708_v3 = vpop.permute.xlu0 %707  ;;  %v793_v47 = vadd.f32 %v792_v38, %v791_v27 }
 0x39c   :  { %v776_v4 = vmul.f32 %v760_v60, %v690_v2  ;;  %v779_v28 = vmul.f32 %v763_v5, %v708_v3 }
 0x39d   :  { %v794_v58 = vrot.slane %v793_v47, 2 }
 0x39e   :  { %v799_v6 = vsel %vm233_vm1, %v776_v4, 0.0  ;;  %v816_v40 = vsel %vm233_vm1, %v779_v28, 0.0 }
 0x39f   :  { %v800_v20 = vadd.f32 %v799_v6, %v798_v17  ;;  %v701_v22 = vpop.permute.xlu1 %700  ;;  %v719_v23 = vpop.permute.xlu0 %718  ;;  %v795_v14 = vadd.f32 %v794_v58, %v793_v47 }
 0x3a0   :  { %v778_v24 = vmul.f32 %v762_v7, %v701_v22  ;;  %v781_v10 = vmul.f32 %v765_v30, %v719_v23 }
 0x3a1   :  { %v801_v31 = vrot.slane %v800_v20, 4 }
 0x3a2   :  { %v808_v29 = vsel %vm233_vm1, %v778_v24, 0.0  ;;  %v825_v11 = vsel %vm233_vm1, %v781_v10, 0.0 }
 0x3a3   :  { %v809_v32 = vadd.f32 %v808_v29, %v807_v8  ;;  %v712_v33 = vpop.permute.xlu1 %711  ;;  %v730_v35 = vpop.permute.xlu0 %729  ;;  %v802_v41 = vadd.f32 %v801_v31, %v800_v20  ;;  %v796_v31 = vrot.slane %v795_v14, 1 }
 0x3a4   :  { %v780_v36 = vmul.f32 %v764_v26, %v712_v33  ;;  %v783_v21 = vmul.f32 %v767_v43, %v730_v35 }
 0x3a5   :  { %v810_v39 = vrot.slane %v809_v32, 4  ;;  %v803_v18 = vrot.slane %v802_v41, 2 }
 0x3a6   :  { %v817_v25 = vsel %vm233_vm1, %v780_v36, 0.0  ;;  %v834_v1 = vsel %vm233_vm1, %v783_v21, 0.0 }
 0x3a7   :  { %v818_v42 = vadd.f32 %v817_v25, %v816_v40  ;;  %v723_v44 = vpop.permute.xlu1 %722  ;;  %v811_v45 = vadd.f32 %v810_v39, %v809_v32  ;;  %v741_v49 = vpop.permute.xlu0 %740  ;;  %v804_v63 = vadd.f32 %v803_v18, %v802_v41  ;;  %v797_v41 = vadd.f32 %v796_v31, %v795_v14 }
 0x3a8   :  { %v782_v46 = vmul.f32 %v766_v37, %v723_v44  ;;  %v785_v60 = vmul.f32 %v769_v51, %v741_v49 }
 0x3a9   :  { %v819_v48 = vrot.slane %v818_v42, 4  ;;  %v812_v55 = vrot.slane %v811_v45, 2  ;;  %v805_v24 = vrot.slane %v804_v63, 1 }
 0x3aa   :  { %v826_v50 = vsel %vm233_vm1, %v782_v46, 0.0  ;;  %v843_v6 = vsel %vm233_vm1, %v785_v60, 0.0 }
 0x3ab   :  { %v820_v52 = vadd.f32 %v819_v48, %v818_v42  ;;  %v827_v53 = vadd.f32 %v826_v50, %v825_v11  ;;  %v734_v54 = vpop.permute.xlu1 %733  ;;  %v752_v3 = vpop.permute.xlu0 %751  ;;  %v813_v7 = vadd.f32 %v812_v55, %v811_v45  ;;  %v806_v38 = vadd.f32 %v805_v24, %v804_v63 }
 0x3ac   :  { %v784_v56 = vmul.f32 %v768_v34, %v734_v54  ;;  %v787_v22 = vmul.f32 %v771_v62, %v752_v3  ;;  %v869_v50 = vpack.c.bf16 %v797_v41, %v797_v41 }
 0x3ad   :  { %v821_v13 = vrot.slane %v820_v52, 2  ;;  %v828_v59 = vrot.slane %v827_v53, 4  ;;  %v814_v28 = vrot.slane %v813_v7, 1  ;;  %v870_v34 = vpack.c.bf16 %v806_v38, %v806_v38 }
 0x3ae   :  { %v835_v61 = vsel %vm233_vm1, %v784_v56, 0.0  ;;  %v852_v36 = vsel %vm233_vm1, %v787_v22, 0.0  ;;  %v889_v58 = vunpack.c.l.b16 %v869_v50  ;;  %v1241_v22 = vld [vmem:[%s1775_s7 + $0x10] sm:$0xff]  }
 0x3af   :  { %v829_v2 = vadd.f32 %v828_v59, %v827_v53  ;;  %v745_v4 = vpop.permute.xlu1 %744  ;;  %v836_v9 = vadd.f32 %v835_v61, %v834_v1  ;;  %v822_v17 = vadd.f32 %v821_v13, %v820_v52  ;;  %v815_v10 = vadd.f32 %v814_v28, %v813_v7 }
 0x3b0   :  { %v786_v5 = vmul.f32 %v770_v57, %v745_v4  ;;  %v890_v53 = vunpack.c.l.b16 %v870_v34 }
 0x3b1   :  { %v830_v19 = vrot.slane %v829_v2, 2  ;;  %v837_v20 = vrot.slane %v836_v9, 4  ;;  %v823_v32 = vrot.slane %v822_v17, 1  ;;  %v871_v49 = vpack.c.bf16 %v815_v10, %v815_v10 }
 0x3b2   :  { %v844_v23 = vsel %vm233_vm1, %v786_v5, 0.0  ;;  %v897_v62 = vsel %vm641_vm4, %v890_v53, %v889_v58 }
 0x3b3   :  { %v831_v26 = vadd.f32 %v830_v19, %v829_v2  ;;  %v845_v27 = vadd.f32 %v844_v23, %v843_v6  ;;  %v756_v8 = vpop.permute.xlu1 %755  ;;  %v838_v29 = vadd.f32 %v837_v20, %v836_v9  ;;  %v824_v42 = vadd.f32 %v823_v32, %v822_v17  ;;  %v1239_v19 = vld [vmem:[%s1775_s7] sm:$0xff]   ;;  %v1240_v20 = vld [vmem:[%s1775_s7 + $0x8] sm:$0xff]   ;;  %v1242_v23 = vld [vmem:[%s1775_s7 + $0x18] sm:$0xff]   ;;  %s1422_s7 = smov 96  }
 0x3b4   :  { %v788_v30 = vmul.f32 %v772_v16, %v756_v8  ;;  %v891_v57 = vunpack.c.l.b16 %v871_v49 }
 0x3b5   :  { %v846_v33 = vrot.slane %v845_v27, 4  ;;  %v832_v15 = vrot.slane %v831_v26, 1  ;;  %v839_v35 = vrot.slane %v838_v29, 2  ;;  %v872_v51 = vpack.c.bf16 %v824_v42, %v824_v42 }
 0x3b6   :  { %v853_v37 = vsel %vm233_vm1, %v788_v30, 0.0  ;;  %v898_v2 = vsel %vm643_vm5, %v891_v57, %v897_v62 }
 0x3b7   :  { %v847_v39 = vadd.f32 %v846_v33, %v845_v27  ;;  %v854_v40 = vadd.f32 %v853_v37, %v852_v36  ;;  %v840_v25 = vadd.f32 %v839_v35, %v838_v29  ;;  %v833_v45 = vadd.f32 %v832_v15, %v831_v26  ;;  %v1134_v29 = vld [vmem:[%s1777_s9] ss:$0 sm:$0xff]  ;;  %s1423_s9 = smov [#allocation9]  }
 0x3b8   :  { %v892_v13 = vunpack.c.l.b16 %v872_v51  ;;  %s1087_s15 = sshll.u32 %s1423_s9, 4  ;;  %s1088_s15 = int_to_ptr.vmem [resolvable:$true] %s1087_s15 }
 0x3b9   :  { %v848_v43 = vrot.slane %v847_v39, 2  ;;  %v855_v44 = vrot.slane %v854_v40, 4  ;;  %v841_v46 = vrot.slane %v840_v25, 1  ;;  %v873_v21 = vpack.c.bf16 %v833_v45, %v833_v45  ;;  %s1361_s22 = scalar_lea.vmem %s1088_s15, 128  ;;  %p1366_p11 = scmp.lt.s32.totalorder %s1088_s15, %s1088_s15 }
 0x3ba   :  { %v899_v4 = vsel %vm645_vm6, %v892_v13, %v898_v2  ;;  %p1362_p10 = scmp.ne.s32.totalorder %s1088_s15, %s1361_s22  ;;  %p1367_p12 = scmp.lt.s32.totalorder %s1361_s22, %s1361_s22 }
 0x3bb   :  { %v849_v47 = vadd.f32 %v848_v43, %v847_v39  ;;  %v856_v48 = vadd.f32 %v855_v44, %v854_v40  ;;  %v842_v11 = vadd.f32 %v841_v46, %v840_v25  ;;  %v893_v61 = vunpack.c.l.b16 %v873_v21  ;;  %v1042_v40 = vpop.permute.xlu1 %1041 }
 0x3bc   :  { %p1368_p13 = por %p1367_p12, %p1366_p11 }
 0x3bd   :  { %v850_v18 = vrot.slane %v849_v47, 1  ;;  %v857_v52 = vrot.slane %v856_v48, 2  ;;  %v874_v54 = vpack.c.bf16 %v842_v11, %v842_v11  ;;  %v900_v9 = vsel %vm647_vm7, %v893_v61, %v899_v4 }
 0x3be   :  { %p1369_p0 = pnand %p1368_p13, %p1362_p10 }
 0x3bf   :  { %v851_v55 = vadd.f32 %v850_v18, %v849_v47  ;;  %v858_v56 = vadd.f32 %v857_v52, %v856_v48  ;;  %v894_v63 = vunpack.c.l.b16 %v874_v54 }
 0x3c1   :  { %v875_v59 = vpack.c.bf16 %v851_v55, %v851_v55  ;;  %v859_v60 = vrot.slane %v858_v56, 1  ;;  %v901_v5 = vsel %vm649_vm8, %v894_v63, %v900_v9 }
 0x3c3   :  { %v860_v1 = vadd.f32 %v859_v60, %v858_v56  ;;  %v895_v3 = vunpack.c.l.b16 %v875_v59 }
 0x3c5   :  { %v876_v7 = vpack.c.bf16 %v860_v1, %v860_v1  ;;  %v902_v14 = vsel %vm651_vm9, %v895_v3, %v901_v5 }
 0x3c7   :  { %v896_v16 = vunpack.c.l.b16 %v876_v7 }
 0x3c9   :  { %v903_v17 = vsel %vm653_vm10, %v896_v16, %v902_v14 }
 0x3ca   :  { %v904_v6 = vpack.c.b16 %v903_v17, %v903_v17 }
 0x3cc   :  { %1196 = vmatmul.mubr.msk.bf16.vlgmr.msra.gmra.mrb[4].mxu0 %vm233_vm1, %v904_v6 }
 0x3cd   :  { %1200 = vmatpush3.bf16.msra.mxu0 %v1239_v19  ;;  %1207 = vmatprep.mubr.msk.bf16.mxu0 %vm1419_vm0, %v1418_v0 }
 0x3ce   :  { %1201 = vmatprep.subr.bf16.mxu0 %v1418_v0 }
 0x3d1   :  { %1202 = vmatpush3.bf16.msra.mxu0 %v1240_v20 }
 0x3d2   :  { %1203 = vmatprep.subr.bf16.mxu0 %v1418_v0 }
 0x3d5   :  { %1204 = vmatpush3.bf16.msra.mxu0 %v1241_v22 }
 0x3d6   :  { %1205 = vmatprep.subr.bf16.mxu0 %v1418_v0 }
 0x3d9   :  { %1206 = vmatpush3.bf16.msra.mxu0 %v1242_v23 }
 0x3dc   :  { %1208 = vmatmul.mubr.msk.bf16.vlgmr.msra.gmra.mrb[8].mxu0 %vm133_vm2, %v1563_v12 }
 0x49f   :  { %v954_v24 = vpop.f32.mrb[4].mxu0 }
 0x4a0   :  { %v1197_v26 = vpop.f32.mrb[5].mxu0 }
 0x4a1   :  { %v957_v27 = vpop.f32.mrb[6].mxu0 }
 0x4a2   :  { %v1198_v8 = vpop.f32.mrb[7].mxu0 }
 0x4af   :  { %v1018_v28 = vpop.f32.mrb[8].mxu0 }
 0x4b0   :  { %v1019_v30 = vadd.f32 %v1018_v28, %v954_v24  ;;  %v1209_v31 = vpop.f32.mrb[9].mxu0 }
 0x4b1   :  { %v1021_v32 = vpop.f32.mrb[10].mxu0 }
 0x4b2   :  { %v1031_v33 = vadd.f32 %v1134_v29, %v1019_v30  ;;  %v1210_v15 = vpop.f32.mrb[11].mxu0 }
 0x4b4   :  { %1287 = vtanh.f32 %v1031_v33  ;;  %v1135_v35 = vmul.f32 -1.442695, %v1031_v33 }
 0x4b6   :  { %1289 = vpow2.f32 %v1135_v35 }
 0x4be   :  { %v1288_v0 = vpop.eup %1287 }
 0x4bf   :  { %1046 = vrot.lane.b32.xlu0 %v1288_v0, %s1414_s27 }
 0x4c0   :  { %v1290_v12 = vpop.eup %1289 }
 0x4c1   :  { %v1035_v36 = vadd.f32 1.0, %v1290_v12 }
 0x4c3   :  { %1291 = vrcp.f32 %v1035_v36 }
 0x4cd   :  { %v1292_v37 = vpop.eup %1291 }
 0x4ce   :  { %v1044_v10 = vmul.f32 %v1292_v37, %v1042_v40 }
 0x531   :  { %v1047_v38 = vpop.permute.xlu0 %1046 }
 0x532   :  { %v1049_v39 = vmul.f32 %v1292_v37, %v1047_v38 }
 0x534   :  { %1051 = vrot.lane.b32.xlu0 %v1049_v39, %s1421_s12 }
 0x5a6   :  { %v1052_v25 = vpop.permute.xlu0 %1051 }
 0x5a7   :  { %v1054_v41 = vadd.f32 %v1052_v25, %v1044_v10 }
 0x5a9   :  { %1293 = vtanh.f32 %v1054_v41 }
 0x5b3   :  { %v1294_v42 = vpop.eup %1293 }
 0x5b4   :  { %1057 = vrot.lane.b32.xlu1 %v1294_v42, %s1414_s27 }
 0x5b8   :  { %1067 = vrot.lane.b32.xlu1 %v1054_v41, %s1422_s7 }
 0x626   :  { %v1058_v43 = vpop.permute.xlu1 %1057 }
 0x627   :  { %v1060_v44 = vmul.f32 %v1292_v37, %v1058_v43 }
 0x629   :  { %1062 = vrot.lane.b32.xlu0 %v1060_v44, %s1421_s12 }
 0x62a   :  { %v1068_v45 = vpop.permute.xlu1 %1067 }
 0x62b   :  { %1070 = vst.msk [vmem:[#allocation9] sm:$0xff] %vm233_vm1, %v1068_v45 }
 0x62c   :  { %1372 = shalt.err (!%p1369_p0)
}
 0x62d   :  { %s1373_s1 = scalar_lea.hbm %s1779_s11, 128 }
 0x62e   :  { %p1374_p1 = scmp.ne.s32.totalorder %s1779_s11, %s1373_s1  ;;  %p1377_p2 = scmp.lt.u32.totalorder %s1373_s1, %s1779_s11 }
 0x630   :  { %p1379_p3 = pnand %p1377_p2, %p1374_p1 }
 0x632   :  { %1382 = shalt.err (!%p1379_p3)
}
 0x633   :  { %1090 = dma.vmem_to_hbm [thread:$0]  %s1088_s15, 128, %s1779_s11, [#allocation10]  }
 0x634   :  { %s1424_s26 = smov [#allocation8]  }
 0x635   :  { %s1077_s6 = sshll.u32 %s1424_s26, 4  ;;  %s1078_s6 = int_to_ptr.vmem [resolvable:$true] %s1077_s6 }
 0x636   :  { %s1383_s28 = scalar_lea.vmem %s1078_s6, 128  ;;  %p1388_p5 = scmp.lt.s32.totalorder %s1078_s6, %s1078_s6 }
 0x637   :  { %p1384_p4 = scmp.ne.s32.totalorder %s1078_s6, %s1383_s28  ;;  %p1389_p6 = scmp.lt.s32.totalorder %s1383_s28, %s1383_s28 }
 0x639   :  { %p1390_p7 = por %p1389_p6, %p1388_p5 }
 0x63b   :  { %p1391_p8 = pnand %p1390_p7, %p1384_p4 }
 0x69b   :  { %v1063_v46 = vpop.permute.xlu0 %1062 }
 0x69c   :  { %1065 = vst.msk [vmem:[#allocation8] sm:$0xff] %vm233_vm1, %v1063_v46 }
 0x69d   :  { %1394 = shalt.err (!%p1391_p8)
}
 0x69e   :  { %s1395_s12 = scalar_lea.hbm %s1778_s10, 128 }
 0x69f   :  { %p1396_p9 = scmp.ne.s32.totalorder %s1778_s10, %s1395_s12  ;;  %p1399_p10 = scmp.lt.u32.totalorder %s1395_s12, %s1778_s10 }
 0x6a1   :  { %p1401_p11 = pnand %p1399_p10, %p1396_p9 }
 0x6a3   :  { %1404 = shalt.err (!%p1401_p11)
}
 0x6a4   :  { %1080 = dma.vmem_to_hbm [thread:$0]  %s1078_s6, 128, %s1778_s10, [#allocation4]  }
 0x6a5   :  { %1409 = dma.done.wait [#allocation4], 128  }
 0x6a6   :  { %1410 = vsyncadd [#allocation4], 4294967168 }
 0x6a7   :  { %1411 = dma.done.wait [#allocation10], 128  }
 0x6a8   :  { %1412 = vsyncadd [#allocation10], 4294967168 }
 0x6a9   :  { %1097 = vsyncpa [#allocation3], 1 }
 0x6aa   :  { %1098 = vsyncpa [#allocation6], 1 }
 0x6ab   :  { %1099 = vsyncpa [#allocation4], 1 }
 0x6ac   :  { %1100 = vsyncpa [#allocation10], 1 }

</bundles_post_ra>
